<compile_context>
chip_gen: v5e
topology: v5e:2x2
jax: 0.10.0
libtpu: 0.0.40
codegen_flags: <defaults>
</compile_context>

<pallas_src>
import functools

import jax
import jax.numpy as jnp
from jax import lax
from jax.experimental import pallas as pl
from jax.experimental.pallas import tpu as pltpu


def _cdiv(a, b):
    return -(-a // b)


def _pick_tiles(batch, out_f, in_f):
    """Tile sizes obeying the (8, 128) rule with minimal edge waste."""
    # M: single block when batch <= 512 (block == full dim is always legal);
    # otherwise 256-row tiles (multiple of 8) with a partial tail block.
    tm = batch if batch <= 512 else 256

    # N: lane dim of the output block -> multiple of 128 (or == out_f).
    if out_f <= 128:
        tn = out_f
    else:
        nf = (out_f // 128) * 128        # largest multiple of 128 <= out_f
        tn = min(512, nf)
        # Expose >= 2 programs on the parallel j axis when possible so both
        # v7x TensorCores get work (costs nothing on v5e/v6e).
        if _cdiv(out_f, tn) < 2 and nf >= 256:
            tn = max(128, ((nf // 2) // 128) * 128)

    # K: lane dim of the x / weight blocks -> multiple of 128 (or == in_f).
    tk = in_f if in_f <= 128 else min(1024, (in_f // 128) * 128)
    return tm, tn, tk


def _gate(w, loc, gamma, zeta):
    """relu(w) * hard-concrete gate(loc); f32 math (no bf16 VPU/EUP on v5e)."""
    w = jnp.maximum(w.astype(jnp.float32), 0.0)
    s = jax.nn.sigmoid(loc.astype(jnp.float32)) * (zeta - gamma) + gamma
    return w * jnp.clip(s, 0.0, 1.0)


def _masked_nt_accumulate(x, wm, b_ref, o_ref, *, in_f, tk, k_mask,
                          compute_dtype):
    """o += x @ wm^T over the K grid axis; zero at k==0, add bias at k==last."""
    k = pl.program_id(2)

    @pl.when(k == 0)
    def _():
        o_ref[...] = jnp.zeros_like(o_ref)

    if k_mask:
        # Zero lanes whose global K index is beyond in_f (partial edge block):
        # garbage there would otherwise feed the contraction.
        lim = in_f - k * tk
        x = jnp.where(lax.broadcasted_iota(jnp.int32, x.shape, 1) < lim, x, 0.0)
        wm = jnp.where(lax.broadcasted_iota(jnp.int32, wm.shape, 1) < lim,
                       wm, 0.0)

    # MXU-native NT contraction: (tm, tk) x (tn, tk) -> (tm, tn)  (= x @ wm.T)
    o_ref[...] += lax.dot_general(
        x.astype(compute_dtype), wm.astype(compute_dtype),
        dimension_numbers=(((1,), (1,)), ((), ())),
        preferred_element_type=jnp.float32)

    @pl.when(k == pl.num_programs(2) - 1)
    def _():
        o_ref[...] += b_ref[...]            # relu(bias), (1, tn) broadcast


def _fused_kernel(x_ref, w_ref, loc_ref, b_ref, o_ref, *,
                  gamma, zeta, in_f, tk, k_mask, compute_dtype):
    wm = _gate(w_ref[...], loc_ref[...], gamma, zeta)
    _masked_nt_accumulate(x_ref[...], wm, b_ref, o_ref, in_f=in_f, tk=tk,
                          k_mask=k_mask, compute_dtype=compute_dtype)


def _gate_fold_kernel(w_ref, loc_ref, wm_ref, *, gamma, zeta):
    wm_ref[...] = _gate(w_ref[...], loc_ref[...], gamma, zeta).astype(
        wm_ref.dtype)


def _matmul_bias_kernel(x_ref, wm_ref, b_ref, o_ref, *,
                        in_f, tk, k_mask, compute_dtype):
    _masked_nt_accumulate(x_ref[...], wm_ref[...], b_ref, o_ref, in_f=in_f,
                          tk=tk, k_mask=k_mask, compute_dtype=compute_dtype)


def monotonic_linear(x, weight, loc, bias, *, gamma=-0.1, zeta=1.1,
                     beta=2.0 / 3.0, compute_dtype=jnp.float32):
    """Forward pass of MonotonicLinearLayer (eval-mode L0Linear sublayer)."""
    # TODO(synk): `beta` (gate temperature) only enters the stochastic
    # training-mode gate sampling / L0 penalty; the eval forward never uses it.
    del beta

    batch, in_f = x.shape
    out_f, in_f_w = weight.shape
    assert in_f == in_f_w and bias.shape == (out_f,)

    tm, tn, tk = _pick_tiles(batch, out_f, in_f)
    gi, gj, gk = _cdiv(batch, tm), _cdiv(out_f, tn), _cdiv(in_f, tk)
    k_mask = (in_f % tk) != 0
    itemsize = jnp.dtype(compute_dtype).itemsize

    # relu(bias) precomputed once in the wrapper (O(out_f)); broadcast row.
    b_relu = jnp.maximum(bias, 0.0).astype(jnp.float32).reshape(1, out_f)

    cp = pltpu.CompilerParams(
        dimension_semantics=("parallel", "parallel", "arbitrary"),
        vmem_limit_bytes=48 * 1024 * 1024,   # actual use ~14 MiB; <= v7x 64 MiB
    )
    out_shape = jax.ShapeDtypeStruct((batch, out_f), jnp.float32)
    x_spec = pl.BlockSpec((tm, tk), lambda i, j, k: (i, k))
    b_spec = pl.BlockSpec((1, tn), lambda i, j, k: (0, j))
    o_spec = pl.BlockSpec((tm, tn), lambda i, j, k: (i, j))

    if gi == 1:
        # Fused path: gate applied in-tile; weight/loc read exactly once.
        kernel = functools.partial(
            _fused_kernel, gamma=gamma, zeta=zeta, in_f=in_f, tk=tk,
            k_mask=k_mask, compute_dtype=compute_dtype)
        return pl.pallas_call(
            kernel,
            out_shape=out_shape,
            grid=(gi, gj, gk),
            in_specs=[
                x_spec,
                pl.BlockSpec((tn, tk), lambda i, j, k: (j, k)),  # weight (N,K)
                pl.BlockSpec((tn, tk), lambda i, j, k: (j, k)),  # loc    (N,K)
                b_spec,
            ],
            out_specs=o_spec,
            compiler_params=cp,
            cost_estimate=pl.CostEstimate(
                flops=2 * batch * out_f * in_f + 5 * out_f * in_f,
                transcendentals=out_f * in_f,
                bytes_accessed=(gj * batch * in_f * x.dtype.itemsize
                                + out_f * in_f * (weight.dtype.itemsize
                                                  + loc.dtype.itemsize)
                                + 4 * out_f + 4 * batch * out_f),
            ),
        )(x, weight, loc, b_relu)

    # Fallback (batch spans multiple M tiles): fold the gate once so weight
    # and loc are each read from HBM exactly once, then run the tiled matmul.
    wm = pl.pallas_call(
        functools.partial(_gate_fold_kernel, gamma=gamma, zeta=zeta),
        out_shape=jax.ShapeDtypeStruct((out_f, in_f), compute_dtype),
        grid=(gj, gk),
        in_specs=[pl.BlockSpec((tn, tk), lambda j, k: (j, k)),
                  pl.BlockSpec((tn, tk), lambda j, k: (j, k))],
        out_specs=pl.BlockSpec((tn, tk), lambda j, k: (j, k)),
        compiler_params=pltpu.CompilerParams(
            dimension_semantics=("parallel", "parallel"),
            vmem_limit_bytes=48 * 1024 * 1024),
        cost_estimate=pl.CostEstimate(
            flops=5 * out_f * in_f,
            transcendentals=out_f * in_f,
            bytes_accessed=out_f * in_f * (weight.dtype.itemsize
                                           + loc.dtype.itemsize + itemsize)),
    )(weight, loc)

    kernel = functools.partial(
        _matmul_bias_kernel, in_f=in_f, tk=tk, k_mask=k_mask,
        compute_dtype=compute_dtype)
    return pl.pallas_call(
        kernel,
        out_shape=out_shape,
        grid=(gi, gj, gk),
        in_specs=[x_spec,
                  pl.BlockSpec((tn, tk), lambda i, j, k: (j, k)),  # wm (N,K)
                  b_spec],
        out_specs=o_spec,
        compiler_params=cp,
        cost_estimate=pl.CostEstimate(
            flops=2 * batch * out_f * in_f,
            transcendentals=0,
            bytes_accessed=(gj * batch * in_f * x.dtype.itemsize
                            + gi * out_f * in_f * itemsize
                            + 4 * out_f + 4 * batch * out_f),
        ),
    )(x, wm, b_relu)


def monotonic_linear_ref(x, weight, loc, bias, *, gamma=-0.1, zeta=1.1):
    """Pure-JAX reference for correctness checking."""
    w = jnp.maximum(weight, 0.0)
    b = jnp.maximum(bias, 0.0)
    mask = jnp.clip(jax.nn.sigmoid(loc) * (zeta - gamma) + gamma, 0.0, 1.0)
    return x @ (w * mask).T + b


if __name__ == "__main__":
    gamma, zeta, beta = -0.1, 1.1, 2.0 / 3.0
    key = jax.random.PRNGKey(0)

    ok = True
    # (batch, in_features, out_features): the module's small shape, a
    # non-aligned shape exercising partial edge blocks / in-kernel K masking,
    # and a large-batch shape exercising the fold+matmul fallback path.
    for (batch, in_features, out_features) in [(8, 32, 32), (16, 300, 272),
                                               (600, 160, 200)]:
        key, kx, kw, kb, kl = jax.random.split(key, 5)
        x = jax.random.normal(kx, (batch, in_features), dtype=jnp.float32)
        # reset_parameters(): weight, bias ~ Uniform(0, 1)
        weight = jax.random.uniform(kw, (out_features, in_features),
                                    dtype=jnp.float32)
        bias = jax.random.uniform(kb, (out_features,), dtype=jnp.float32)
        # L0Linear gate location params: loc ~ Normal(0, 0.01)
        loc = 0.01 * jax.random.normal(kl, (out_features, in_features),
                                       dtype=jnp.float32)

        ref = monotonic_linear_ref(x, weight, loc, bias, gamma=gamma,
                                   zeta=zeta)

        out = jax.block_until_ready(
            monotonic_linear(x, weight, loc, bias,
                             gamma=gamma, zeta=zeta, beta=beta))
        assert out.shape == (batch, out_features)
        ok &= bool(jnp.allclose(out, ref, atol=5e-5, rtol=5e-5))

        # bf16 matmul operands (gate math + f32 accumulation unchanged):
        # halves the weight-stream bytes on the bandwidth-bound path.
        out_bf16 = jax.block_until_ready(
            monotonic_linear(x, weight, loc, bias, gamma=gamma, zeta=zeta,
                             beta=beta, compute_dtype=jnp.bfloat16))
        assert out_bf16.shape == (batch, out_features)
        ok &= bool(jnp.allclose(out_bf16, ref, atol=0.25, rtol=0.05))

    assert ok
    print("KERNEL_OK")
</pallas_src>

<mosaic_0001>
module attributes {stable_mosaic.version = 11 : i64} {
  func.func @_fused_kernel(%arg0: i32, %arg1: i32, %arg2: i32, %arg3: memref<8x32xf32, #tpu.memory_space<vmem>>, %arg4: memref<32x32xf32, #tpu.memory_space<vmem>>, %arg5: memref<32x32xf32, #tpu.memory_space<vmem>>, %arg6: memref<1x32xf32, #tpu.memory_space<vmem>>, %arg7: memref<8x32xf32, #tpu.memory_space<vmem>>) attributes {dimension_semantics = [#tpu.dimension_semantics<parallel>, #tpu.dimension_semantics<parallel>, #tpu.dimension_semantics<arbitrary>], iteration_bounds = array<i64: 1, 1, 1>, scalar_prefetch = 0 : i64, scratch_operands = 0 : i64, tpu.core_type = #tpu.core_type<tc>, window_params = [{transform_indices = @transform_0, window_bounds = array<i64: 8, 32>}, {transform_indices = @transform_1, window_bounds = array<i64: 32, 32>}, {transform_indices = @transform_2, window_bounds = array<i64: 32, 32>}, {transform_indices = @transform_3, window_bounds = array<i64: 1, 32>}, {transform_indices = @transform_4, window_bounds = array<i64: 8, 32>}]} {
    %c0 = arith.constant 0 : index
    %c0_0 = arith.constant 0 : index
    %0 = vector.load %arg4[%c0, %c0_0] : memref<32x32xf32, #tpu.memory_space<vmem>>, vector<32x32xf32>
    %c0_1 = arith.constant 0 : index
    %c0_2 = arith.constant 0 : index
    %1 = vector.load %arg5[%c0_1, %c0_2] : memref<32x32xf32, #tpu.memory_space<vmem>>, vector<32x32xf32>
    %cst = arith.constant 0.000000e+00 : f32
    %2 = vector.broadcast %cst : f32 to vector<32x32xf32>
    %3 = arith.maximumf %0, %2 : vector<32x32xf32>
    %4 = arith.negf %1 : vector<32x32xf32>
    %5 = math.exp %4 : vector<32x32xf32>
    %cst_3 = arith.constant 1.000000e+00 : f32
    %6 = vector.broadcast %cst_3 : f32 to vector<32x32xf32>
    %7 = arith.addf %6, %5 : vector<32x32xf32>
    %8 = arith.divf %6, %7 : vector<32x32xf32>
    %cst_4 = arith.constant 1.200000e+00 : f32
    %9 = vector.broadcast %cst_4 : f32 to vector<32x32xf32>
    %10 = arith.mulf %8, %9 : vector<32x32xf32>
    %cst_5 = arith.constant -1.000000e-01 : f32
    %11 = vector.broadcast %cst_5 : f32 to vector<32x32xf32>
    %12 = arith.addf %10, %11 : vector<32x32xf32>
    %cst_6 = arith.constant 0.000000e+00 : f32
    %cst_7 = arith.constant 1.000000e+00 : f32
    %13 = vector.broadcast %cst_6 : f32 to vector<32x32xf32>
    %14 = arith.maximumf %13, %12 : vector<32x32xf32>
    %15 = vector.broadcast %cst_7 : f32 to vector<32x32xf32>
    %16 = arith.minimumf %15, %14 : vector<32x32xf32>
    %17 = arith.mulf %3, %16 : vector<32x32xf32>
    %c0_8 = arith.constant 0 : index
    %c0_9 = arith.constant 0 : index
    %18 = vector.load %arg3[%c0_8, %c0_9] : memref<8x32xf32, #tpu.memory_space<vmem>>, vector<8x32xf32>
    %c0_i32 = arith.constant 0 : i32
    %19 = arith.cmpi eq, %arg2, %c0_i32 : i32
    %20 = arith.extui %19 : i1 to i32
    %c0_i32_10 = arith.constant 0 : i32
    %21 = arith.cmpi ne, %20, %c0_i32_10 : i32
    scf.if %21 {
      %cst_18 = arith.constant 0.000000e+00 : f32
      %29 = vector.broadcast %cst_18 : f32 to vector<8x32xf32>
      %c0_19 = arith.constant 0 : index
      %c0_20 = arith.constant 0 : index
      %30 = vector.load %arg7[%c0_19, %c0_20] : memref<8x32xf32, #tpu.memory_space<vmem>>, vector<8x32xf32>
      tpu.vector_store %arg7[%c0_19, %c0_20], %29 {strides = array<i32>} : memref<8x32xf32, #tpu.memory_space<vmem>>, vector<8x32xf32>,
    } else {
    }
    %c0_11 = arith.constant 0 : index
    %c0_12 = arith.constant 0 : index
    %22 = vector.load %arg7[%c0_11, %c0_12] : memref<8x32xf32, #tpu.memory_space<vmem>>, vector<8x32xf32>
    %cst_13 = arith.constant dense<0.000000e+00> : vector<8x32xf32>
    %23 = tpu.matmul %18, %17, %cst_13 {dimension_numbers = #tpu.dot_dimension_numbers<[1], [1], [0], [0], [0, 0, 1, 0], [], []>} : vector<8x32xf32>, vector<32x32xf32>, vector<8x32xf32> -> vector<8x32xf32>
    %24 = arith.addf %22, %23 : vector<8x32xf32>
    %c0_14 = arith.constant 0 : index
    %c0_15 = arith.constant 0 : index
    %25 = vector.load %arg7[%c0_14, %c0_15] : memref<8x32xf32, #tpu.memory_space<vmem>>, vector<8x32xf32>
    tpu.vector_store %arg7[%c0_14, %c0_15], %24 {strides = array<i32>} : memref<8x32xf32, #tpu.memory_space<vmem>>, vector<8x32xf32>,
    %c0_i32_16 = arith.constant 0 : i32
    %26 = arith.cmpi eq, %arg2, %c0_i32_16 : i32
    %27 = arith.extui %26 : i1 to i32
    %c0_i32_17 = arith.constant 0 : i32
    %28 = arith.cmpi ne, %27, %c0_i32_17 : i32
    scf.if %28 {
      %c0_18 = arith.constant 0 : index
      %c0_19 = arith.constant 0 : index
      %29 = vector.load %arg7[%c0_18, %c0_19] : memref<8x32xf32, #tpu.memory_space<vmem>>, vector<8x32xf32>
      %c0_20 = arith.constant 0 : index
      %c0_21 = arith.constant 0 : index
      %30 = vector.load %arg6[%c0_20, %c0_21] : memref<1x32xf32, #tpu.memory_space<vmem>>, vector<1x32xf32>
      %31 = vector.broadcast %30 : vector<1x32xf32> to vector<8x32xf32>
      %32 = arith.addf %29, %31 : vector<8x32xf32>
      %c0_22 = arith.constant 0 : index
      %c0_23 = arith.constant 0 : index
      %33 = vector.load %arg7[%c0_22, %c0_23] : memref<8x32xf32, #tpu.memory_space<vmem>>, vector<8x32xf32>
      tpu.vector_store %arg7[%c0_22, %c0_23], %32 {strides = array<i32>} : memref<8x32xf32, #tpu.memory_space<vmem>>, vector<8x32xf32>,
    } else {
    }
    return
  }
  func.func @transform_0(%arg0: i32, %arg1: i32, %arg2: i32) -> (i32, i32) {
    %c0_i32 = arith.constant 0 : i32
    return %arg0, %arg2 : i32, i32
  }
  func.func @transform_1(%arg0: i32, %arg1: i32, %arg2: i32) -> (i32, i32) {
    %c0_i32 = arith.constant 0 : i32
    return %arg1, %arg2 : i32, i32
  }
  func.func @transform_2(%arg0: i32, %arg1: i32, %arg2: i32) -> (i32, i32) {
    %c0_i32 = arith.constant 0 : i32
    return %arg1, %arg2 : i32, i32
  }
  func.func @transform_3(%arg0: i32, %arg1: i32, %arg2: i32) -> (i32, i32) {
    %c0_i32 = arith.constant 0 : i32
    %c0_i32_0 = arith.constant 0 : i32
    return %c0_i32, %arg1 : i32, i32
  }
  func.func @transform_4(%arg0: i32, %arg1: i32, %arg2: i32) -> (i32, i32) {
    %c0_i32 = arith.constant 0 : i32
    return %arg0, %arg1 : i32, i32
  }
}

</mosaic_0001>

<bundles_post_ra>
// kernel: tpu_custom_call.1
= control target key start
LH: loop header
LB: loop body
LE: loop exit
PB: predicated region body
PF: predicated region fallthrough
CT: control target
= control target key end

     0   :  { %9 = vsyncpa [#allocation3], 0  ;;  %s482_s0 = inlined_call_operand.hbm [shape: f32[8,32], index: 0, kind: input, shape index: {}]   ;;  %s483_s1 = inlined_call_operand.hbm [shape: f32[32,32], index: 1, kind: input, shape index: {}]   ;;  %s484_s2 = inlined_call_operand.hbm [shape: f32[32,32], index: 2, kind: input, shape index: {}]   ;;  %s485_s3 = inlined_call_operand.vmem [shape: f32[1,32], index: 3, kind: input, shape index: {}]   ;;  %s486_s4 = inlined_call_operand.hbm [shape: f32[8,32], index: 4, kind: output, shape index: {}]  }
   0x1   :  { %10 = vsyncpa [#allocation6], 0  ;;  %s27_s17 = sshll.u32 %s483_s1, 4  ;;  %s28_s17 = int_to_ptr.hbm [resolvable:$true] %s27_s17 }
   0x2   :  { %11 = vsyncpa [#allocation4], 0  ;;  %s380_s18 = smov [#allocation5]   ;;  %s17_s22 = sshll.u32 %s482_s0, 4  ;;  %s18_s22 = int_to_ptr.hbm [resolvable:$true] %s17_s22 }
   0x3   :  { %s29_s19 = sshll.u32 %s380_s18, 4  ;;  %s381_s23 = smov 128   ;;  %s30_s19 = int_to_ptr.vmem [resolvable:$true] %s29_s19 }
   0x4   :  { %s382_s24 = smov 8   ;;  %s383_s25 = smov [#allocation2]  }
   0x5   :  { %35 = dma.hbm_to_vmem [thread:$0]  %s28_s17, 512, %s30_s19, [#allocation6], %s381_s23, %s381_s23, %s382_s24  }
   0x6   :  { %s19_s26 = sshll.u32 %s383_s25, 4  ;;  %s40_s29 = sshll.u32 %s484_s2, 4  ;;  %s20_s26 = int_to_ptr.vmem [resolvable:$true] %s19_s26  ;;  %s41_s29 = int_to_ptr.hbm [resolvable:$true] %s40_s29 }
   0x7   :  { %22 = dma.hbm_to_vmem [thread:$0]  %s18_s22, 128, %s20_s26, [#allocation3]  }
   0x8   :  { %s384_s1 = smov [#allocation7]  }
   0x9   :  { %s42_s30 = sshll.u32 %s384_s1, 4  ;;  %s43_s30 = int_to_ptr.vmem [resolvable:$true] %s42_s30 }
   0xa   :  { %48 = dma.hbm_to_vmem [thread:$0]  %s41_s29, 512, %s43_s30, [#allocation6], %s381_s23, %s381_s23, %s382_s24  }
   0xb   :  { %374 = dma.done.wait [#allocation3], 128  }
   0xc   :  { %375 = vsyncadd [#allocation3], 4294967168 }
   0xd   :  { %376 = dma.done.wait [#allocation6], 1024  }
   0xe   :  { %377 = vsyncadd [#allocation6], 4294966272  ;;  %v70_v0 = vld [vmem:[#allocation7 + $0x18] sm:$0xff]  ;;  %v69_v1 = vld [vmem:[#allocation7 + $0x10] sm:$0xff]  ;;  %vm176_vm0 = vcmask 261120   ;;  %v385_v35 = vmov 0.0  }
   0xf   :  { %v248_v2 = vmul.f32 -1.442695, %v70_v0  ;;  %v247_v3 = vmul.f32 -1.442695, %v69_v1  ;;  %v68_v4 = vld [vmem:[#allocation7 + $0x8] sm:$0xff]  ;;  %v67_v6 = vld [vmem:[#allocation7] sm:$0xff] }
  0x10   :  { %v246_v5 = vmul.f32 -1.442695, %v68_v4  ;;  %v245_v7 = vmul.f32 -1.442695, %v67_v6  ;;  %177 = vst.msk [vmem:[#allocation8] sm:$0xff] %vm176_vm0, %v385_v35  ;;  %v66_v60 = vld [vmem:[#allocation5 + $0x18] sm:$0xff] }
  0x11   :  { %262 = vpow2.f32 %v248_v2  ;;  %v65_v1 = vld [vmem:[#allocation5 + $0x10] sm:$0xff]  ;;  %v63_v23 = vld [vmem:[#allocation5] sm:$0xff]  ;;  %s386_s5 = smov [#allocation8]   ;;  %s234_s9 = sshll.u32 %s486_s4, 4  ;;  %s235_s9 = int_to_ptr.hbm [resolvable:$true] %s234_s9 }
  0x12   :  { %264 = vpow2.f32 %v247_v3  ;;  %s232_s6 = sshll.u32 %s386_s5, 4  ;;  %s233_s6 = int_to_ptr.vmem [resolvable:$true] %s232_s6 }
  0x13   :  { %266 = vpow2.f32 %v246_v5  ;;  %v74_v5 = vmax.f32 %v66_v60, 0.0 }
  0x14   :  { %268 = vpow2.f32 %v245_v7 }
  0x17   :  { %v263_v8 = vpop.eup %262 }
  0x18   :  { %v265_v9 = vpop.eup %264  ;;  %v90_v10 = vadd.f32 1.0, %v263_v8 }
  0x19   :  { %v267_v11 = vpop.eup %266  ;;  %v89_v12 = vadd.f32 1.0, %v265_v9 }
  0x1a   :  { %v269_v13 = vpop.eup %268  ;;  %270 = vrcp.f32 %v90_v10  ;;  %v88_v14 = vadd.f32 1.0, %v267_v11  ;;  %v145_v16 = vand.u32 2147483647, %v90_v10  ;;  %v147_v17 = vand.u32 2147483648, %v90_v10 }
  0x1b   :  { %272 = vrcp.f32 %v89_v12  ;;  %v87_v15 = vadd.f32 1.0, %v269_v13  ;;  %v130_v18 = vand.u32 2147483647, %v89_v12  ;;  %v132_v20 = vand.u32 2147483648, %v89_v12 }
  0x1c   :  { %274 = vrcp.f32 %v88_v14  ;;  %vm141_vm1 = vweird.f32 %v90_v10  ;;  %vm421_vm2 = vcmp.eq.f32.partialorder %v145_v16, 8.507059e+37  ;;  %vm126_vm3 = vweird.f32 %v89_v12 }
  0x1d   :  { %276 = vrcp.f32 %v87_v15  ;;  %v148_v26 = vor.u32 1.1754944e-38, %v147_v17  ;;  %vm425_vm5 = vcmp.eq.f32.partialorder %v130_v18, 8.507059e+37  ;;  %v133_v30 = vor.u32 1.1754944e-38, %v132_v20 }
  0x1e   :  { %vm111_vm7 = vweird.f32 %v88_v14  ;;  %v115_v34 = vand.u32 2147483647, %v88_v14  ;;  %v117_v38 = vand.u32 2147483648, %v88_v14  ;;  %vm96_vm9 = vweird.f32 %v87_v15 }
  0x1f   :  { %v102_v43 = vand.u32 2147483648, %v87_v15  ;;  %v100_v46 = vand.u32 2147483647, %v87_v15 }
  0x20   :  { %v271_v19 = vpop.eup %270  ;;  %vm443_vm13 = vcmp.eq.f32.partialorder %v115_v34, 8.507059e+37  ;;  %v118_v53 = vor.u32 1.1754944e-38, %v117_v38 }
  0x21   :  { %v273_v21 = vpop.eup %272  ;;  %v137_v22 = vmul.f32 %v271_v19, %v90_v10  ;;  %vm142_vm4 = vweird.f32 %v271_v19  ;;  %v103_v59 = vor.u32 1.1754944e-38, %v102_v43 }
  0x22   :  { %v122_v24 = vmul.f32 %v273_v21, %v89_v12  ;;  %v275_v28 = vpop.eup %274  ;;  %vm127_vm6 = vweird.f32 %v273_v21  ;;  %vm431_vm8 = vmor %vm141_vm1, %vm142_vm4  ;;  %vm101_vm1 = vcmp.eq.f32.partialorder %v100_v46, 8.507059e+37  ;;  %v73_v12 = vmax.f32 %v65_v1, 0.0 }
  0x23   :  { %v138_v25 = vsub.f32 1.0, %v137_v22  ;;  %v277_v31 = vpop.eup %276  ;;  %v107_v33 = vmul.f32 %v275_v28, %v88_v14  ;;  %vm437_vm10 = vmor %vm126_vm3, %vm127_vm6  ;;  %vm112_vm11 = vweird.f32 %v275_v28 }
  0x24   :  { %v123_v29 = vsub.f32 1.0, %v122_v24  ;;  %v92_v39 = vmul.f32 %v277_v31, %v87_v15  ;;  %vm97_vm12 = vweird.f32 %v277_v31  ;;  %vm452_vm14 = vmor %vm111_vm7, %vm112_vm11  ;;  %v64_v15 = vld [vmem:[#allocation5 + $0x8] sm:$0xff] }
  0x25   :  { %v139_v32 = vmul.f32 %v271_v19, %v138_v25  ;;  %v108_v42 = vsub.f32 1.0, %v107_v33  ;;  %vm459_vm15 = vmor %vm96_vm9, %vm97_vm12  ;;  %v72_v20 = vmax.f32 %v64_v15, 0.0  ;;  %v71_v25 = vmax.f32 %v63_v23, 0.0 }
  0x26   :  { %v124_v37 = vmul.f32 %v273_v21, %v123_v29  ;;  %v93_v45 = vsub.f32 1.0, %v92_v39  ;;  %v178_v29 = vld [vmem:[#allocation8] sm:$0xff] }
  0x27   :  { %v140_v40 = vadd.f32 %v271_v19, %v139_v32  ;;  %v109_v48 = vmul.f32 %v275_v28, %v108_v42  ;;  %v261_v32 = vld [vmem:[%s485_s3] ss:$0 sm:$0xff] }
  0x28   :  { %v125_v44 = vadd.f32 %v273_v21, %v124_v37  ;;  %v94_v54 = vmul.f32 %v277_v31, %v93_v45 }
  0x29   :  { %v144_v47 = vsel %vm431_vm8, %v271_v19, %v140_v40  ;;  %v110_v57 = vadd.f32 %v275_v28, %v109_v48 }
  0x2a   :  { %v149_v50 = vsel %vm421_vm2, %v148_v26, %v144_v47  ;;  %v129_v51 = vsel %vm437_vm10, %v273_v21, %v125_v44  ;;  %v95_v62 = vadd.f32 %v277_v31, %v94_v54 }
  0x2b   :  { %v154_v55 = vmul.f32 1.2, %v149_v50  ;;  %v134_v56 = vsel %vm425_vm5, %v133_v30, %v129_v51  ;;  %v114_v0 = vsel %vm452_vm14, %v275_v28, %v110_v57  ;;  %v171_v28 = vld [vmem:[#allocation2] sm:$0xff] }
  0x2c   :  { %v153_v61 = vmul.f32 1.2, %v134_v56  ;;  %v119_v3 = vsel %vm443_vm13, %v118_v53, %v114_v0  ;;  %v99_v4 = vsel %vm459_vm15, %v277_v31, %v95_v62 }
  0x2d   :  { %v158_v63 = vadd.f32 -0.1, %v154_v55  ;;  %v152_v7 = vmul.f32 1.2, %v119_v3  ;;  %v104_v8 = vsel %vm101_vm1, %v103_v59, %v99_v4 }
  0x2e   :  { %v157_v2 = vadd.f32 -0.1, %v153_v61  ;;  %v151_v10 = vmul.f32 1.2, %v104_v8 }
  0x2f   :  { %v162_v6 = vmax.f32 %v158_v63, 0.0  ;;  %v156_v13 = vadd.f32 -0.1, %v152_v7 }
  0x30   :  { %v161_v9 = vmax.f32 %v157_v2, 0.0  ;;  %v155_v16 = vadd.f32 -0.1, %v151_v10 }
  0x31   :  { %v166_v11 = vmin.f32 %v162_v6, 1.0  ;;  %v160_v18 = vmax.f32 %v156_v13, 0.0 }
  0x32   :  { %v165_v14 = vmin.f32 %v161_v9, 1.0  ;;  %v159_v22 = vmax.f32 %v155_v16, 0.0 }
  0x33   :  { %v170_v17 = vmul.f32 %v166_v11, %v74_v5  ;;  %v164_v21 = vmin.f32 %v160_v18, 1.0 }
  0x34   :  { %v169_v19 = vmul.f32 %v165_v14, %v73_v12  ;;  %v163_v26 = vmin.f32 %v159_v22, 1.0 }
  0x35   :  { %249 = vmatpush.xpose.msk.msra.mxu0 %vm176_vm0, %v170_v17  ;;  %v168_v24 = vmul.f32 %v164_v21, %v72_v20 }
  0x36   :  { %v167_v27 = vmul.f32 %v163_v26, %v71_v25 }
  0x39   :  { %250 = vmatpush.xpose.msk.msra.mxu0 %vm176_vm0, %v169_v19 }
  0x3d   :  { %251 = vmatpush.xpose.msk.msra.mxu0 %vm176_vm0, %v168_v24 }
  0x41   :  { %252 = vmatpush.xpose.msk.msra.mxu0 %vm176_vm0, %v167_v27 }
  0x44   :  { %253 = vmatmul.msk.f32.vlgmr.msra.gmra.mxu0 %vm176_vm0, %v171_v28 }
  0xc1   :  { %v212_v30 = vpop.f32.mrf.mxu0 }
  0xc2   :  { %v215_v31 = vadd.f32 %v212_v30, %v178_v29 }
  0xc4   :  { %216 = vst.msk [vmem:[#allocation8] sm:$0xff] %vm176_vm0, %v215_v31 }
  0xcb   :  { %v220_v33 = vld [vmem:[#allocation8] sm:$0xff] }
  0xcc   :  { %v225_v34 = vadd.f32 %v261_v32, %v220_v33 }
  0xce   :  { %226 = vst.msk [vmem:[#allocation8] sm:$0xff] %vm176_vm0, %v225_v34 }
  0xcf   :  { %237 = dma.vmem_to_hbm [thread:$0]  %s233_s6, 128, %s235_s9, [#allocation4]  }
  0xd0   :  { %378 = dma.done.wait [#allocation4], 128  }
  0xd1   :  { %379 = vsyncadd [#allocation4], 4294967168 }
  0xd2   :  { %242 = vsyncpa [#allocation3], 1 }
  0xd3   :  { %243 = vsyncpa [#allocation6], 1 }
  0xd4   :  { %244 = vsyncpa [#allocation4], 1 }

</bundles_post_ra>
